<compile_context>
chip_gen: v7x
topology: tpu7x:2x2x1
jax: 0.10.0
libtpu: 0.0.40
codegen_flags: <defaults>
</compile_context>

<pallas_src>
import math

import jax
import jax.numpy as jnp
from jax.experimental import pallas as pl
from jax.experimental.pallas import tpu as pltpu


def _add_bias_kernel(x_ref, b_ref, o_ref):
    # x_ref: (tile_r, tile_l); b_ref: (1, tile_l) bias row.
    # Pure VPU broadcast-add; kernel is entirely HBM-bandwidth bound.
    o_ref[...] = x_ref[...] + b_ref[...]


def _sublane(dtype) -> int:
    # Sub-32-bit dtypes pack along sublanes: row tiles should be a multiple of
    # 8 (32-bit), 16 (bf16/f16), 32 (int8/fp8).
    return max(8, 32 // jnp.dtype(dtype).itemsize)


def _cdiv(a, b):
    return -(-a // b)


def _round_up(a, m):
    return _cdiv(a, m) * m


_TARGET_BLOCK_BYTES = 4 * 1024 * 1024  # ~4 MiB per x/out block (MB-scale tiles)


def _vmem_limit_bytes(block_bytes):
    # Double-buffered x + out blocks + bias row + slack.  Cap is
    # generation-aware: ~38 MiB on v7x (64 MiB physical), 48 MiB on v5e/v6e
    # (128 MiB physical), always >= 24 MiB to lift v5e's 16 MiB default.
    try:
        phys = pltpu.get_tpu_info().vmem_capacity_bytes
    except Exception:
        phys = 64 * 1024 * 1024  # conservative (v7x per-TC)
    cap = min(48 * 1024 * 1024, int(phys * 0.6))
    return int(min(cap, max(24 * 1024 * 1024, 6 * block_bytes)))


def _bias_add_2d(x2d, bias_row):
    """x2d: (R, L); bias_row: (1, L) per-column (lane-dense) bias."""
    R, L = x2d.shape
    itemsize = jnp.dtype(x2d.dtype).itemsize
    sub = _sublane(x2d.dtype)

    # Lane tile: prefer the full (lane-dense) extent; cap it (multiple of 128)
    # so at least one sublane group of rows still fits the byte budget.
    max_lane = max(128, (_TARGET_BLOCK_BYTES // (sub * itemsize)) // 128 * 128)
    tile_l = L if L <= max_lane else max_lane

    # Row tile from the byte budget, rounded to the sublane packing.
    tile_r = _TARGET_BLOCK_BYTES // max(1, tile_l * itemsize)
    tile_r = max(sub, (tile_r // sub) * sub)
    if tile_r >= R:
        tile_r = R  # full extent is always a legal block shape

    # Degenerate-grid fixup: dimension_semantics "parallel" only feeds both
    # v7x TensorCores if there are blocks to shard.  Prefer splitting rows
    # (keeps output stores lane-dense); only then split lanes, and only on
    # 128-aligned L so every lane block stays aligned.
    def nblocks(tr, tl):
        return _cdiv(R, tr) * _cdiv(L, tl)

    if nblocks(tile_r, tile_l) < 4:
        if R >= 2 * sub:
            tile_r = min(tile_r, max(sub, _round_up(_cdiv(R, 4), sub)))
        if nblocks(tile_r, tile_l) < 4 and L >= 256 and L % 128 == 0:
            tile_l = min(tile_l, max(128, _round_up(_cdiv(L, 2), 128)))

    grid = (_cdiv(R, tile_r), _cdiv(L, tile_l))
    block_bytes = tile_r * tile_l * itemsize

    return pl.pallas_call(
        _add_bias_kernel,
        out_shape=jax.ShapeDtypeStruct((R, L), x2d.dtype),
        grid=grid,
        in_specs=[
            pl.BlockSpec((tile_r, tile_l), lambda i, j: (i, j)),
            pl.BlockSpec((1, tile_l), lambda i, j: (0, j)),
        ],
        out_specs=pl.BlockSpec((tile_r, tile_l), lambda i, j: (i, j)),
        compiler_params=pltpu.CompilerParams(
            dimension_semantics=("parallel", "parallel"),
            vmem_limit_bytes=_vmem_limit_bytes(block_bytes),
        ),
    )(x2d, bias_row)


class AddBias:
    """JAX/Pallas port of the PyTorch AddBias module (bias stored as (C, 1))."""

    def __init__(self, bias_1d, min_pallas_bytes=4 << 20):
        # bias_1d: (C,) -> stored as (C, 1), matching nn.Parameter(bias.unsqueeze(1)).
        self._bias = jnp.asarray(bias_1d).reshape(-1, 1)
        self._min_pallas_bytes = min_pallas_bytes
        self._bias_row_cache = {}  # per-(shape, dtype) prepared bias rows

    def _cached(self, key, build):
        row = self._bias_row_cache.get(key)
        if row is None:
            row = build()
            self._bias_row_cache[key] = row
        return row

    def __call__(self, x):
        c = self._bias.shape[0]
        if x.ndim not in (2, 4):
            raise ValueError("AddBias expects 2D (N,C) or 4D (N,C,H,W) input")

        dtype = x.dtype
        total_bytes = x.size * jnp.dtype(dtype).itemsize

        def xla_add():
            # Fused XLA broadcast-add: faster than kernel launch for tiny
            # inputs and used for rare ragged small-C shapes.
            b = self._bias.reshape(-1).astype(dtype)
            if x.ndim == 2:
                return x + b.reshape(1, c)
            return x + b.reshape(1, c, 1, 1)

        if total_bytes < self._min_pallas_bytes:
            return xla_add()

        if x.ndim == 2:
            n, cc = x.shape
            assert cc == c, "channel mismatch"
            feat = c
            x2d = x
            bias_feat = self._cached(
                ("2d", dtype.name),
                lambda: self._bias.reshape(-1).astype(dtype))
        else:
            n, cc, h, w = x.shape
            assert cc == c, "channel mismatch"
            feat = c * h * w
            x2d = x.reshape(n, feat)  # contiguous NCHW reshape: free, no transpose
            bias_feat = self._cached(
                ("4d", h * w, dtype.name),
                lambda: jnp.repeat(self._bias.reshape(-1).astype(dtype), h * w))

        if feat >= 128:
            # Feature axis already lane-dense: (1, feat) bias row directly.
            out2d = _bias_add_2d(x2d, bias_feat.reshape(1, feat))
        else:
            # Small feature axis: lane-densify by folding k rows into the lane
            # axis (k*feat = lcm(feat, 128)); no transpose / extra HBM pass.
            k = 128 // math.gcd(feat, 128)
            if n % k != 0:
                return xla_add()
            bias_k = self._cached(
                ("fold", feat, k, dtype.name),
                lambda: jnp.tile(bias_feat, k))
            out2d = _bias_add_2d(
                x2d.reshape(n // k, k * feat),
                bias_k.reshape(1, k * feat),
            ).reshape(n, feat)

        return out2d if x.ndim == 2 else out2d.reshape(n, c, h, w)


if __name__ == "__main__":
    key = jax.random.PRNGKey(0)
    k_bias, k_bias_w, k_x4, k_x2a, k_x2b, k_x2w = jax.random.split(key, 6)

    C = 4
    bias = jax.random.normal(k_bias, (C,), dtype=jnp.float32)

    # min_pallas_bytes=0 forces the Pallas path even at these small test shapes.
    module = AddBias(bias, min_pallas_bytes=0)
    # Default module exercises the small-input fused-XLA fallback path.
    module_small = AddBias(bias)

    # 4D case: NCHW, batch=2, channels=4, spatial=16x16 -> Pallas on (N, C*H*W).
    x4 = jax.random.normal(k_x4, (2, C, 16, 16), dtype=jnp.float32)
    ref4 = x4 + bias.reshape(1, C, 1, 1)
    y4 = jax.block_until_ready(module(x4))
    assert y4.shape == x4.shape and y4.dtype == x4.dtype
    assert jnp.allclose(y4, ref4, atol=1e-6), "4D mismatch"
    y4s = jax.block_until_ready(module_small(x4))
    assert jnp.allclose(y4s, ref4, atol=1e-6), "4D fallback mismatch"

    # 2D case, small C, N not a multiple of the fold factor -> XLA fallback.
    x2a = jax.random.normal(k_x2a, (8, C), dtype=jnp.float32)
    ref2a = x2a + bias.reshape(1, C)
    y2a = jax.block_until_ready(module(x2a))
    assert y2a.shape == x2a.shape and jnp.allclose(y2a, ref2a, atol=1e-6), "2D mismatch"

    # 2D case, small C, N % (128 // gcd(C,128)) == 0 -> lane-dense fold Pallas path.
    x2b = jax.random.normal(k_x2b, (64, C), dtype=jnp.float32)
    ref2b = x2b + bias.reshape(1, C)
    y2b = jax.block_until_ready(module(x2b))
    assert y2b.shape == x2b.shape and jnp.allclose(y2b, ref2b, atol=1e-6), "2D fold mismatch"

    # 2D case, lane-dense C >= 128 -> direct (1, C) bias-row Pallas path.
    CW = 128
    bias_w = jax.random.normal(k_bias_w, (CW,), dtype=jnp.float32)
    module_w = AddBias(bias_w, min_pallas_bytes=0)
    x2w = jax.random.normal(k_x2w, (8, CW), dtype=jnp.float32)
    ref2w = x2w + bias_w.reshape(1, CW)
    y2w = jax.block_until_ready(module_w(x2w))
    assert y2w.shape == x2w.shape and jnp.allclose(y2w, ref2w, atol=1e-6), "2D wide mismatch"

    print("KERNEL_OK")
</pallas_src>

<mosaic_0001>
module attributes {stable_mosaic.version = 11 : i64} {
  func.func @_add_bias_kernel(%arg0: i32, %arg1: i32, %arg2: memref<2x512xf32, #tpu.memory_space<vmem>>, %arg3: memref<1x512xf32, #tpu.memory_space<vmem>>, %arg4: memref<2x512xf32, #tpu.memory_space<vmem>>) attributes {dimension_semantics = [#tpu.dimension_semantics<parallel>, #tpu.dimension_semantics<parallel>], iteration_bounds = array<i64: 1, 2>, scalar_prefetch = 0 : i64, scratch_operands = 0 : i64, tpu.core_type = #tpu.core_type<tc>, window_params = [{transform_indices = @transform_0, window_bounds = array<i64: 2, 512>}, {transform_indices = @transform_1, window_bounds = array<i64: 1, 512>}, {transform_indices = @transform_2, window_bounds = array<i64: 2, 512>}]} {
    %c0 = arith.constant 0 : index
    %c0_0 = arith.constant 0 : index
    %0 = vector.load %arg2[%c0, %c0_0] : memref<2x512xf32, #tpu.memory_space<vmem>>, vector<2x512xf32>
    %c0_1 = arith.constant 0 : index
    %c0_2 = arith.constant 0 : index
    %1 = vector.load %arg3[%c0_1, %c0_2] : memref<1x512xf32, #tpu.memory_space<vmem>>, vector<1x512xf32>
    %2 = vector.broadcast %1 : vector<1x512xf32> to vector<2x512xf32>
    %3 = arith.addf %0, %2 : vector<2x512xf32>
    %c0_3 = arith.constant 0 : index
    %c0_4 = arith.constant 0 : index
    %4 = vector.load %arg4[%c0_3, %c0_4] : memref<2x512xf32, #tpu.memory_space<vmem>>, vector<2x512xf32>
    tpu.vector_store %arg4[%c0_3, %c0_4], %3 {strides = array<i32>} : memref<2x512xf32, #tpu.memory_space<vmem>>, vector<2x512xf32>,
    return
  }
  func.func @transform_0(%arg0: i32, %arg1: i32) -> (i32, i32) {
    %c0_i32 = arith.constant 0 : i32
    return %arg0, %arg1 : i32, i32
  }
  func.func @transform_1(%arg0: i32, %arg1: i32) -> (i32, i32) {
    %c0_i32 = arith.constant 0 : i32
    %c0_i32_0 = arith.constant 0 : i32
    return %c0_i32, %arg1 : i32, i32
  }
  func.func @transform_2(%arg0: i32, %arg1: i32) -> (i32, i32) {
    %c0_i32 = arith.constant 0 : i32
    return %arg0, %arg1 : i32, i32
  }
}

</mosaic_0001>

<bundles_post_ra>
// kernel: tpu_custom_call.1
= control target key start
LH: loop header
LB: loop body
LE: loop exit
PB: predicated region body
PF: predicated region fallthrough
CT: control target
= control target key end

     0   :  { %7 = vsyncpa [#allocation3], 0  ;;  %s858_s0 = inlined_call_operand.hbm [shape: f32[2,1024], index: 0, kind: input, shape index: {}]   ;;  %s859_s1 = inlined_call_operand.hbm [shape: f32[1,1024], index: 1, kind: input, shape index: {}]   ;;  %s860_s2 = inlined_call_operand.hbm [shape: f32[2,1024], index: 2, kind: output, shape index: {}]  }
   0x1   :  { %9 = vsyncpa [#allocation3 + $0x1], 0 }
   0x2   :  { %10 = vsyncpa [#allocation6], 0 }
   0x3   :  { %12 = vsyncpa [#allocation6 + $0x1], 0 }
   0x4   :  { %13 = vsyncpa [#allocation4], 0 }
   0x5   :  { %15 = vsyncpa [#allocation4 + $0x1], 0  ;;  %s639_s9 = smov 0   ;;  %s641_s10 = smov 0  }
   0x6   :  { %s643_s11 = smov 0   ;;  %s645_s12 = smov 0  }
   0x7   :  { %s647_s13 = smov 0   ;;  %s649_s14 = smov 0  }
   0x8 LB: > { %s382_s15 = sadd.s32 4294967295, %s618_s14   ;;  %s383_s16 = sadd.s32 4294967294, %s618_s14   ;;  %s618_s14 = sphi %s649_s14, %s21_s14   ;;  %s614_s13 = sphi %s647_s13, %s880_s13   ;;  %s610_s12 = sphi %s645_s12, %s879_s12   ;;  %s606_s11 = sphi %s643_s11, %s878_s11   ;;  %s602_s10 = sphi %s641_s10, %s877_s10   ;;  %s598_s9 = sphi %s639_s9, %s876_s9  }
   0x9   : > { %s30_s17 = sadd.s32 1, %s614_s13  ;;  %s42_s18 = sadd.s32 1, %s606_s11 }
   0xa   : > { %p31_p0 = scmp.ge.s32.totalorder %s30_s17, 2  ;;  %p49_p1 = scmp.ne.s32.totalorder %s606_s11, %s602_s10 }
   0xb   : > { %p50_p2 = scmp.eq.s32.totalorder %s618_s14, 0  ;;  %p55_p3 = scmp.ne.s32.totalorder %s602_s10, %s598_s9 }
   0xc   : > { %s882_s17 = smov (%p31_p0, %s30_s17), 0  ;;  %p56_p5 = scmp.eq.s32.totalorder %s382_s15, 0 }
   0xd   : > { %p680_p4 = por %p50_p2, %p49_p1  ;;  %s38_s20 = ssub.s32 %s614_s13, %s882_s17 }
   0xe   : > { %p107_p6 = scmp.eq.s32.totalorder %s382_s15, 1  ;;  %p40_p7 = scmp.eq.s32.totalorder %s38_s20, 0 }
   0xf   : > { %p686_p8 = por %p56_p5, %p55_p3  ;;  %p113_p10 = scmp.eq.s32.totalorder %s383_s16, 1 }
  0x10   : > { %p690_p9 = por %p107_p6, %p49_p1  ;;  %p421_p13 = scmp.lt.s32.totalorder %s618_s14, 2 }
  0x11   : > { %s864_s21 = scalar_select %p686_p8, 1, 0 }
  0x12   : > { %s865_s22 = scalar_select %p690_p9, 1, 0 }
  0x13   : > { %s695_s23 = scalar_select %p40_p7, %s606_s11, %s42_s18  }
  0x14   : > { %p697_p11 = por %p113_p10, %p55_p3  ;;  %s704_s25 = sand.u32 1, %s606_s11  }
  0x15   : > { %s386_s26 = sshll.u32 %s704_s25, 3  ;;  %s401_s27 = sshll.u32 %s614_s13, 7 }
  0x16   : > { %s866_s24 = scalar_select %p697_p11, 1, 0 }
  0x17   : > { %s711_s30 = scalar_lea.hbm %s858_s0, %s401_s27  ;;  %s137_s3 = scalar_lea.vmem [#allocation2], %s386_s26 }
  0x18   : > { %s147_s4 = sshll.u32 %s137_s3, 4  ;;  %p717_p0 = pnand %p421_p13, %p680_p4  ;;  %s713_s4 = int_to_ptr.vmem [resolvable:$true] %s147_s4 }
  0x19   : > { %s134_s6 = scalar_lea.sflag [#allocation3], %s704_s25  ;;  %s472_s7 = scalar_lea.hbm %s711_s30, 128 }
  0x1a   : > { %p473_p3 = scmp.ne.s32.totalorder %s711_s30, %s472_s7  ;;  %p474_p5 = pneg %p717_p0 }
  0x1b   : > { %s477_s16 = scalar_lea.hbm %s858_s0, 256  ;;  %p478_p4 = scmp.lt.u32.totalorder %s711_s30, %s858_s0 }
  0x1c   : > { %p475_p6 = pnand %p474_p5, %p473_p3  ;;  %p479_p10 = scmp.lt.u32.totalorder %s477_s16, %s472_s7 }
  0x1d   : > { %p481_p12 = scmp.lt.u32.totalorder %s472_s7, %s711_s30 }
  0x1e   : > { %p476_p7 = pneg %p475_p6  ;;  %p480_p13 = por %p479_p10, %p478_p4 }
  0x20   : > { %p482_p1 = por %p481_p12, %p480_p13 }
  0x22   : > { %p483_p2 = pnand %p482_p1, %p476_p7 }
  0x24   : > { %486 = shalt.err (!%p483_p2)
}
  0x25   : > { %s487_s20 = scalar_lea.vmem %s713_s4, 128  ;;  %s620_s26 = smov [#allocation2]  }
  0x26   : > { %p488_p3 = scmp.ne.s32.totalorder %s713_s4, %s487_s20  ;;  %s492_s27 = sshll.u32 %s620_s26, 4  ;;  %s493_s27 = int_to_ptr.vmem [resolvable:$false] %s492_s27 }
  0x27   : > { %s494_s28 = scalar_lea.vmem %s493_s27, 256  ;;  %p495_p9 = scmp.lt.s32.totalorder %s713_s4, %s493_s27 }
  0x28   : > { %p490_p6 = pnand %p488_p3, %p474_p5  ;;  %p496_p4 = scmp.lt.s32.totalorder %s494_s28, %s487_s20 }
  0x2a   : > { %p491_p11 = pneg %p490_p6  ;;  %p497_p10 = por %p496_p4, %p495_p9 }
  0x2c   : > { %p498_p12 = pnand %p497_p10, %p491_p11 }
  0x2e   : > { %501 = shalt.err (!%p498_p12)
}
  0x2f   : > { %413 = dma.hbm_to_vmem [thread:$0]  (!%p717_p0), %s711_s30, 128, %s713_s4, %s134_s6  }
  0x30   : > { %p868_p1 = scmp.lt.s32.totalorder %s618_s14, 3  ;;  %p869_p2 = scmp.ge.s32.totalorder %s618_s14, 1 }
  0x31   : > { %s389_s3 = sshll.u32 %s704_s25, 2  ;;  %s402_s7 = sshll.u32 %s614_s13, 6 }
  0x32   : > { %p753_p7 = pnand %p869_p2, %p868_p1  ;;  %s762_s16 = scalar_lea.hbm %s859_s1, %s402_s7 }
  0x33   : > { %s158_s18 = scalar_lea.vmem [#allocation5], %s389_s3  ;;  %s155_s30 = scalar_lea.sflag [#allocation6], %s704_s25 }
  0x34   : > { %s870_s29 = scalar_select %p753_p7, 1, 0 }
  0x35   : > { %s166_s19 = sshll.u32 %s158_s18, 4  ;;  %s502_s4 = scalar_lea.hbm %s762_s16, 64  ;;  %s167_s19 = int_to_ptr.vmem [resolvable:$true] %s166_s19 }
  0x36   : > { %p503_p9 = scmp.ne.s32.totalorder %s762_s16, %s502_s4  ;;  %s507_s26 = scalar_lea.hbm %s859_s1, 128 }
  0x37   : > { %p508_p3 = scmp.lt.u32.totalorder %s762_s16, %s859_s1  ;;  %p509_p6 = scmp.lt.u32.totalorder %s507_s26, %s502_s4 }
  0x38   : > { %p505_p11 = pnand %p503_p9, %p474_p5  ;;  %p511_p10 = scmp.lt.u32.totalorder %s502_s4, %s762_s16 }
  0x39   : > { %p510_p4 = por %p509_p6, %p508_p3 }
  0x3a   : > { %p506_p13 = pneg %p505_p11 }
  0x3b   : > { %p512_p12 = por %p511_p10, %p510_p4 }
  0x3d   : > { %p513_p1 = pnand %p512_p12, %p506_p13 }
  0x3f   : > { %516 = shalt.err (!%p513_p1)
}
  0x40   : > { %s517_s25 = scalar_lea.vmem %s167_s19, 64  ;;  %s621_s3 = smov [#allocation5]  }
  0x41   : > { %p518_p2 = scmp.ne.s32.totalorder %s167_s19, %s517_s25  ;;  %s522_s7 = sshll.u32 %s621_s3, 4  ;;  %s523_s7 = int_to_ptr.vmem [resolvable:$false] %s522_s7 }
  0x42   : > { %s524_s8 = scalar_lea.vmem %s523_s7, 128  ;;  %p525_p8 = scmp.lt.s32.totalorder %s167_s19, %s523_s7 }
  0x43   : > { %p520_p9 = pnand %p518_p2, %p474_p5  ;;  %p526_p7 = scmp.lt.s32.totalorder %s524_s8, %s517_s25 }
  0x45   : > { %p521_p11 = pneg %p520_p9  ;;  %p527_p3 = por %p526_p7, %p525_p8 }
  0x47   : > { %p528_p6 = pnand %p527_p3, %p521_p11 }
  0x49   : > { %531 = shalt.err (!%p528_p6)
}
  0x4a   : > { %416 = dma.hbm_to_vmem [thread:$0]  (!%p717_p0), %s762_s16, 64, %s167_s19, %s155_s30  }
  0x4b   : > { %p871_p13 = scmp.ne.s32.totalorder %s870_s29, 0 }
  0x4c   : > { %s787_s15 = sand.u32 (!%p871_p13), 1, %s602_s10   ;;  %p872_p8 = scmp.ne.s32.totalorder (!%p871_p13), %s864_s21, 0 }
  0x4d   : > { %175 = sbr.rel (%p871_p13) target bundleno = 118 (0x76), region = 28  ;;  %s393_s18 = sshll.u32 (!%p871_p13), %s787_s15, 3 }
  0x4e   : > { %s178_s4 = scalar_lea.sflag (!%p871_p13), [#allocation3], %s787_s15  ;;  %s181_s6 = scalar_lea.vmem (!%p871_p13), [#allocation2], %s393_s18 }
  0x54   : > { %585 = dma.done.wait (%p872_p8), %s178_s4, 128  }
  0x55   : > { %587 = vsyncadd (%p872_p8), %s178_s4, 4294967168  ;;  %s394_s5 = sshll.u32 %s787_s15, 2  ;;  %s187_s29 = scalar_lea.sflag [#allocation6], %s787_s15 }
  0x56   : > { %s190_s16 = scalar_lea.vmem [#allocation5], %s394_s5 }
  0x57   : > { %589 = dma.done.wait (%p872_p8), %s187_s29, 64  }
  0x58   : > { %591 = vsyncadd (%p872_p8), %s187_s29, 4294967232  ;;  %v222_v0 = vlaneseq  ;;  %v622_v1 = vmov 1983009808   ;;  %v220_v9 = vld [vmem:[%s190_s16] sm:$0xf]  ;;  %v219_v19 = vld [vmem:[%s181_s6] sm:$0xff] }
  0x59   : > { %v241_v2 = vunpack.c.l.s4 %v622_v1  ;;  %s215_s21 = scalar_lea.vmem [#allocation7], %s393_s18  ;;  %s403_s30 = sshll.u32 %s610_s12, 7 }
  0x5a   : > { %v223_v3 = vshrl.u32 %v222_v0, 7  ;;  %s275_s19 = sshll.u32 %s215_s21, 4  ;;  %s811_s27 = scalar_lea.hbm %s860_s2, %s403_s30  ;;  %s806_s19 = int_to_ptr.vmem [resolvable:$true] %s275_s19 }
  0x5b   : > { %v242_v4 = vunpack.c.0.s8 %v241_v2  ;;  %s259_s28 = scalar_lea.sflag [#allocation4], %s787_s15  ;;  %s532_s25 = scalar_lea.vmem %s806_s19, 128 }
  0x5c   : > { %v224_v5 = vsub.s32 0, %v223_v3  ;;  %v228_v6 = vsub.s32 1, %v223_v3  ;;  %v232_v7 = vsub.s32 2, %v223_v3  ;;  %v236_v8 = vsub.s32 3, %v223_v3  ;;  %p533_p0 = scmp.ne.s32.totalorder %s806_s19, %s532_s25  ;;  %p873_p5 = scmp.ne.s32.totalorder %s865_s22, 0 }
  0x5d   : > { %v245_v10 = vsub.s32 %v242_v4, %v223_v3  ;;  %s623_s12 = smov [#allocation7]  }
  0x5e   : > { %v225_v11 = vrot.slane %v220_v9, %v224_v5  ;;  %v229_v12 = vrot.slane %v220_v9, %v228_v6  ;;  %v233_v13 = vrot.slane %v220_v9, %v232_v7  ;;  %v237_v14 = vrot.slane %v220_v9, %v236_v8  ;;  %p534_p7 = pnand %p533_p0, %p873_p5  ;;  %s536_s3 = sshll.u32 %s623_s12, 4  ;;  %s537_s3 = int_to_ptr.vmem [resolvable:$false] %s536_s3 }
  0x5f   : > { %s538_s7 = scalar_lea.vmem %s537_s3, 256  ;;  %p539_p10 = scmp.lt.s32.totalorder %s806_s19, %s537_s3 }
  0x60   : > { %v238_v15 = vcombine.low %v225_v11, %v229_v12  ;;  %v239_v16 = vcombine.low %v233_v13, %v237_v14  ;;  %p535_p4 = pneg %p534_p7  ;;  %p540_p12 = scmp.lt.s32.totalorder %s538_s7, %s532_s25 }
  0x62   : > { %v246_v17 = vrot.slane %v238_v15, %v245_v10  ;;  %v253_v18 = vrot.slane %v239_v16, %v245_v10  ;;  %p541_p1 = por %p540_p12, %p539_p10 }
  0x64   : > { %v254_v20 = vcombine.low %v246_v17, %v253_v18  ;;  %p542_p2 = pnand %p541_p1, %p535_p4 }
  0x66   : > { %v256_v21 = vadd.f32 %v254_v20, %v219_v19 }
  0x68   : > { %257 = vst [vmem:[%s215_s21] sm:$0xff] %v256_v21 }
  0x69   : > { %545 = shalt.err (!%p542_p2)
}
  0x6a   : > { %s546_s8 = scalar_lea.hbm %s811_s27, 128  ;;  %s550_s4 = scalar_lea.hbm %s860_s2, 256 }
  0x6b   : > { %p547_p9 = scmp.ne.s32.totalorder %s811_s27, %s546_s8  ;;  %p551_p6 = scmp.lt.u32.totalorder %s811_s27, %s860_s2 }
  0x6c   : > { %p552_p13 = scmp.lt.u32.totalorder %s550_s4, %s546_s8  ;;  %p554_p0 = scmp.lt.u32.totalorder %s546_s8, %s811_s27 }
  0x6d   : > { %p548_p11 = pnand %p547_p9, %p873_p5 }
  0x6e   : > { %p553_p8 = por %p552_p13, %p551_p6 }
  0x6f   : > { %p549_p3 = pneg %p548_p11 }
  0x70   : > { %p555_p7 = por %p554_p0, %p553_p8 }
  0x72   : > { %p556_p4 = pnand %p555_p7, %p549_p3 }
  0x74   : > { %559 = shalt.err (!%p556_p4)
}
  0x75   : > { %408 = dma.vmem_to_hbm [thread:$0]  (%p873_p5), %s806_s19, 128, %s811_s27, %s259_s28  }
  0x76 PF: > { %s287_s29 = sand.u32 1, %s598_s9   ;;  %p874_p10 = scmp.ne.s32.totalorder %s866_s24, 0 }
  0x77   : > { %p875_p12 = scmp.ge.s32.totalorder %s618_s14, 2  ;;  %s288_s16 = scalar_lea.sflag [#allocation4], %s287_s29 }
  0x79   : > { %p418_p1 = pnand %p875_p12, %p874_p10 }
  0x7b   : > { %593 = dma.done.wait (!%p418_p1), %s288_s16, 128  }
  0x7c   : > { %595 = vsyncadd (!%p418_p1), %s288_s16, 4294967168  ;;  %s21_s14 = sadd.s32 1, %s618_s14   ;;  %s876_s9 = smov %s602_s10 }
  0x7d   : > { %p18_p2 = scmp.ge.s32.totalorder %s21_s14, 4   ;;  %s877_s10 = smov %s606_s11 }
  0x7e   : > { %s878_s11 = smov %s695_s23  ;;  %s879_s12 = smov %s614_s13 }
  0x7f   : > { %s880_s13 = smov %s882_s17  ;;  %20 = sbr.rel (!%p18_p2) target bundleno = 8 (0x8), region = 86 }
  0x86   :  { %293 = vsyncpa [#allocation3], 1 }
  0x87   :  { %295 = vsyncpa [#allocation3 + $0x1], 1 }
  0x88   :  { %296 = vsyncpa [#allocation6], 1 }
  0x89   :  { %298 = vsyncpa [#allocation6 + $0x1], 1 }
  0x8a   :  { %299 = vsyncpa [#allocation4], 1 }
  0x8b   :  { %301 = vsyncpa [#allocation4 + $0x1], 1 }

</bundles_post_ra>
